<compile_context>
chip_gen: v7x
topology: tpu7x:2x2x1
jax: 0.10.0
libtpu: 0.0.40
codegen_flags: <defaults>
</compile_context>

<pallas_src>
import jax
import jax.numpy as jnp
from jax import lax
from jax.experimental import pallas as pl
from jax.experimental.pallas import tpu as pltpu

_LANE = 128
_BN_EPS = 1e-5


def _round_up(x, m):
    return ((x + m - 1) // m) * m


def _pad2d(x, rows, cols):
    r, c = x.shape
    return jnp.pad(x, ((0, rows - r), (0, cols - c)))


def _vmem_limit_bytes():
    """Chip-aware scoped-VMEM limit: ~48 MiB on v7x, ~96 MiB on v5e/v6e."""
    cap = 64 * 1024 * 1024                         # conservative fallback (v7x)
    try:
        cap = int(getattr(pltpu.get_tpu_info(), "vmem_capacity_bytes", cap))
    except Exception:
        pass
    return max(32 * 1024 * 1024, min(cap * 3 // 4, 100 * 1024 * 1024))


def _choose_tile_b(batch, cap=256):
    """Batch tile: multiple of 16, minimal padding; >=2 tiles when worthwhile
    (megacore sharding on v7x).  Tiny batches use one exact-size tile (block
    dim == full array dim, so no batch padding at all)."""
    if batch < 32:
        return batch
    n_tiles = max(pl.cdiv(batch, cap), 2)
    return _round_up(pl.cdiv(batch, n_tiles), 16)


# ----------------------------------------------------------------------------
# Fused kernel (factory closes over static tiling constants).
# ----------------------------------------------------------------------------
def _make_kernel(t_a_total, t_v_total, tile_t_a, tile_t_v, mask_a, mask_v):
    inv_ta = 1.0 / t_a_total
    inv_tv = 1.0 / t_v_total

    def kernel(a_ref, v_ref,
               w1a_ref, b1a_ref, w2a_ref,
               w1v_ref, b1v_ref, w2v_ref,
               wo1_ref, wo2_ref, bo2_ref,
               out_ref, a_acc, v_acc):
        t = pl.program_id(1)
        nt = pl.num_programs(1)

        @pl.when(t == 0)
        def _init():
            a_acc[...] = jnp.zeros_like(a_acc)
            v_acc[...] = jnp.zeros_like(v_acc)

        # --- time-tiled average pool: accumulate sums in f32 (no full-tile
        # f32 copy of the input; masking only when the T tiling is ragged) ---
        a_tile = a_ref[...]
        if mask_a:
            idx = t * tile_t_a + lax.broadcasted_iota(
                jnp.int32, (1,) + a_ref.shape[1:], 1)
            a_tile = jnp.where(idx < t_a_total, a_tile, 0.0)
        a_acc[...] += jnp.sum(a_tile, axis=1, dtype=jnp.float32)

        v_tile = v_ref[...]
        if mask_v:
            idx = t * tile_t_v + lax.broadcasted_iota(
                jnp.int32, (1,) + v_ref.shape[1:], 1)
            v_tile = jnp.where(idx < t_v_total, v_tile, 0.0)
        v_acc[...] += jnp.sum(v_tile, axis=1, dtype=jnp.float32)

        # --- matmul chain + store only on the last T step ---
        @pl.when(t == nt - 1)
        def _finalize():
            cdt = w1a_ref.dtype                       # bf16 matmul operands
            a_pool = (a_acc[...] * inv_ta).astype(cdt)
            v_pool = (v_acc[...] * inv_tv).astype(cdt)

            # audio branch: Linear (BN pre-folded) -> ReLU -> Linear
            ha = jnp.dot(a_pool, w1a_ref[...],
                         preferred_element_type=jnp.float32) + b1a_ref[...]
            ea = jnp.dot(jnp.maximum(ha, 0.0).astype(cdt), w2a_ref[...],
                         preferred_element_type=jnp.float32)
            # video branch
            hv = jnp.dot(v_pool, w1v_ref[...],
                         preferred_element_type=jnp.float32) + b1v_ref[...]
            ev = jnp.dot(jnp.maximum(hv, 0.0).astype(cdt), w2v_ref[...],
                         preferred_element_type=jnp.float32)

            # concat + fused head matmul; all head biases pre-folded into bo2
            e = jnp.concatenate([ea, ev], axis=-1).astype(cdt)
            h = jnp.dot(e, wo1_ref[...], preferred_element_type=jnp.float32)
            out = jnp.dot(h.astype(cdt), wo2_ref[...],
                          preferred_element_type=jnp.float32) + bo2_ref[...]
            out_ref[...] = out.astype(out_ref.dtype)

    return kernel


# ----------------------------------------------------------------------------
# One-time parameter preparation (hoisted out of the forward path).
# ----------------------------------------------------------------------------
def prepare_params(params, *, eps=_BN_EPS, compute_dtype=jnp.bfloat16):
    """Fold BN into the first Linear, fold the head-bias chain into one output
    bias, stack the split concat weight, pad internal widths to lane multiples
    of 128, cast matmul weights to the compute dtype.  Exact."""
    f32 = jnp.float32

    def fold_bn(w, b, gamma, beta, mean, var):
        scale = gamma / jnp.sqrt(var + eps)
        shift = beta - mean * scale
        return w * scale[None, :], b * scale + shift

    w1a, b1a = fold_bn(params["w1a"], params["b1a"], params["bn_a_gamma"],
                       params["bn_a_beta"], params["bn_a_mean"], params["bn_a_var"])
    w1v, b1v = fold_bn(params["w1v"], params["b1v"], params["bn_v_gamma"],
                       params["bn_v_beta"], params["bn_v_mean"], params["bn_v_var"])

    h4 = params["w2a"].shape[1]
    wo1a = params["wo1"][:h4, :]
    wo1v = params["wo1"][h4:, :]

    # Bias-chain fold (exact):
    #   e = [ha@w2a + b2a, hv@w2v + b2v];  h = e@wo1 + bo1;  out = h@wo2 + bo2
    bo1_eff = params["bo1"] + params["b2a"] @ wo1a + params["b2v"] @ wo1v
    bo2_eff = params["bo2"] + bo1_eff @ params["wo2"]

    D_a, H = w1a.shape
    D_v = w1v.shape[0]
    C = params["wo2"].shape[1]
    Hp = _round_up(H, _LANE)
    H4p = _round_up(h4, _LANE)
    Cp = _round_up(C, _LANE)

    cd = compute_dtype
    prepared = dict(
        w1a=_pad2d(w1a, D_a, Hp).astype(cd),
        b1a=_pad2d(b1a[None, :], 1, Hp).astype(f32),
        w2a=_pad2d(params["w2a"], Hp, H4p).astype(cd),
        w1v=_pad2d(w1v, D_v, Hp).astype(cd),
        b1v=_pad2d(b1v[None, :], 1, Hp).astype(f32),
        w2v=_pad2d(params["w2v"], Hp, H4p).astype(cd),
        # pre-stacked head weight: cat([ea, ev]) @ wo1_stacked  (exact)
        wo1=jnp.vstack([_pad2d(wo1a, H4p, H4p),
                        _pad2d(wo1v, H4p, H4p)]).astype(cd),
        wo2=_pad2d(params["wo2"], H4p, Cp).astype(cd),
        bo2=_pad2d(bo2_eff[None, :], 1, Cp).astype(f32),
    )
    meta = dict(num_classes=int(C), padded_classes=int(Cp))
    return prepared, meta


# ----------------------------------------------------------------------------
# Forward wrapper.
# ----------------------------------------------------------------------------
def adaptive_concat_base_forward(audio_feature, video_feature, prepared, meta):
    B, T_a, D_a = audio_feature.shape
    Bv, T_v, D_v = video_feature.shape
    assert Bv == B
    C, Cp = meta["num_classes"], meta["padded_classes"]

    weights = (prepared["w1a"], prepared["b1a"], prepared["w2a"],
               prepared["w1v"], prepared["b1v"], prepared["w2v"],
               prepared["wo1"], prepared["wo2"], prepared["bo2"])
    weight_bytes = sum(int(w.size) * w.dtype.itemsize for w in weights)

    vmem_limit = _vmem_limit_bytes()
    tile_b = _choose_tile_b(B)

    # ---- bytes-derived time tiling so VMEM never scales with T*D ----------
    isz_a = audio_feature.dtype.itemsize
    isz_v = video_feature.dtype.itemsize
    in_budget = max(vmem_limit - 2 * weight_bytes - (4 << 20), 4 << 20)

    def per_step_bytes(tb, ta, tv):          # two inputs, double-buffered
        return 2 * tb * (ta * D_a * isz_a + tv * D_v * isz_v)

    tt_a, tt_v = T_a, T_v
    need = per_step_bytes(tile_b, tt_a, tt_v)
    if need > in_budget and max(T_a, T_v) > 8:
        shrink = pl.cdiv(need, in_budget)
        tt_a = min(T_a, max(8, _round_up(pl.cdiv(T_a, shrink), 8)))
        tt_v = min(T_v, max(8, _round_up(pl.cdiv(T_v, shrink), 8)))
    while per_step_bytes(tile_b, tt_a, tt_v) > in_budget and tile_b > 16:
        tile_b = max(16, ((tile_b // 2) // 16) * 16)

    nb = pl.cdiv(B, tile_b)
    nt_a = pl.cdiv(T_a, tt_a)
    nt_v = pl.cdiv(T_v, tt_v)
    nt = max(nt_a, nt_v)
    mask_a = (nt * tt_a != T_a)
    mask_v = (nt * tt_v != T_v)

    def _time_map(nt_x):
        if nt_x == nt:
            return lambda b, t: (b, t, 0)
        last = nt_x - 1
        return lambda b, t: (b, jnp.minimum(t, last), 0)

    # Inputs are passed UNPADDED and UNCAST: the ragged last batch/time block
    # (if any) is handled by the Pallas partial-block DMA + in-kernel masking;
    # garbage rows in a partial batch block stay row-local and are sliced off.
    in_specs = [
        pl.BlockSpec((tile_b, tt_a, D_a), _time_map(nt_a)),
        pl.BlockSpec((tile_b, tt_v, D_v), _time_map(nt_v)),
    ] + [
        # Weights/biases: constant block index -> VMEM-resident across tiles.
        pl.BlockSpec(w.shape, lambda b, t: (0, 0)) for w in weights
    ]
    out_spec = pl.BlockSpec((tile_b, Cp), lambda b, t: (b, 0))
    b_out = nb * tile_b                       # only the (small) output is padded

    kernel = _make_kernel(T_a, T_v, tt_a, tt_v, mask_a, mask_v)

    Hp = prepared["w1a"].shape[1]
    H4p = prepared["w2a"].shape[1]
    flops = 2 * B * (T_a * D_a + T_v * D_v
                     + D_a * Hp + D_v * Hp + 2 * Hp * H4p
                     + 2 * H4p * H4p + H4p * Cp)
    bytes_accessed = (audio_feature.size * isz_a + video_feature.size * isz_v
                      + weight_bytes + b_out * Cp * 4)
    cost = pl.CostEstimate(flops=int(flops), transcendentals=0,
                           bytes_accessed=int(bytes_accessed))

    out = pl.pallas_call(
        kernel,
        grid=(nb, nt),
        in_specs=in_specs,
        out_specs=out_spec,
        out_shape=jax.ShapeDtypeStruct((b_out, Cp), jnp.float32),
        scratch_shapes=[pltpu.VMEM((tile_b, D_a), jnp.float32),
                        pltpu.VMEM((tile_b, D_v), jnp.float32)],
        compiler_params=pltpu.CompilerParams(
            dimension_semantics=("parallel", "arbitrary"),
            vmem_limit_bytes=int(vmem_limit)),
        cost_estimate=cost,
    )(audio_feature, video_feature, *weights)

    return out[:B, :C]


# ----------------------------------------------------------------------------
# Parameter init + pure-JAX reference (PyTorch eval-mode semantics).
# ----------------------------------------------------------------------------
def init_params(key, audio_embed_dim, video_embed_dim, hidden_dim, num_classes):
    h4 = hidden_dim // 4
    h2 = hidden_dim // 2
    ks = jax.random.split(key, 12)

    def lin(k, fan_in, fan_out):
        kw, kb = jax.random.split(k)
        bound = 1.0 / jnp.sqrt(fan_in)
        w = jax.random.uniform(kw, (fan_in, fan_out), jnp.float32, -bound, bound)
        b = jax.random.uniform(kb, (fan_out,), jnp.float32, -bound, bound)
        return w, b

    w1a, b1a = lin(ks[0], audio_embed_dim, hidden_dim)
    w2a, b2a = lin(ks[1], hidden_dim, h4)
    w1v, b1v = lin(ks[2], video_embed_dim, hidden_dim)
    w2v, b2v = lin(ks[3], hidden_dim, h4)
    wo1, bo1 = lin(ks[4], h2, h4)
    wo2, bo2 = lin(ks[5], h4, num_classes)

    return dict(
        w1a=w1a, b1a=b1a, w2a=w2a, b2a=b2a,
        w1v=w1v, b1v=b1v, w2v=w2v, b2v=b2v,
        wo1=wo1, bo1=bo1, wo2=wo2, bo2=bo2,
        bn_a_gamma=1.0 + 0.1 * jax.random.normal(ks[6], (hidden_dim,)),
        bn_a_beta=0.1 * jax.random.normal(ks[7], (hidden_dim,)),
        bn_a_mean=0.1 * jax.random.normal(ks[8], (hidden_dim,)),
        bn_a_var=jnp.abs(1.0 + 0.1 * jax.random.normal(ks[9], (hidden_dim,))),
        bn_v_gamma=1.0 + 0.1 * jax.random.normal(ks[10], (hidden_dim,)),
        bn_v_beta=0.1 * jax.random.normal(ks[11], (hidden_dim,)),
        bn_v_mean=jnp.zeros((hidden_dim,), jnp.float32),
        bn_v_var=jnp.ones((hidden_dim,), jnp.float32),
    )


def reference_forward(audio_feature, video_feature, params):
    eps = _BN_EPS
    a = jnp.mean(audio_feature, axis=1)
    v = jnp.mean(video_feature, axis=1)

    def branch(x, w1, b1, g, be, m, var, w2, b2):
        h = x @ w1 + b1
        h = (h - m) / jnp.sqrt(var + eps) * g + be
        h = jnp.maximum(h, 0.0)
        return h @ w2 + b2

    ea = branch(a, params["w1a"], params["b1a"], params["bn_a_gamma"],
                params["bn_a_beta"], params["bn_a_mean"], params["bn_a_var"],
                params["w2a"], params["b2a"])
    ev = branch(v, params["w1v"], params["b1v"], params["bn_v_gamma"],
                params["bn_v_beta"], params["bn_v_mean"], params["bn_v_var"],
                params["w2v"], params["b2v"])
    e = jnp.concatenate([ea, ev], axis=1)
    h = e @ params["wo1"] + params["bo1"]
    return h @ params["wo2"] + params["bo2"]


if __name__ == "__main__":
    B = 4
    T_a, T_v = 8, 12
    audio_embed_dim, video_embed_dim = 32, 48
    hidden_dim, num_classes = 32, 10

    key = jax.random.PRNGKey(0)
    k_a, k_v, k_p = jax.random.split(key, 3)
    audio_feature = jax.random.normal(k_a, (B, T_a, audio_embed_dim), jnp.float32)
    video_feature = jax.random.normal(k_v, (B, T_v, video_embed_dim), jnp.float32)
    params = init_params(k_p, audio_embed_dim, video_embed_dim,
                         hidden_dim, num_classes)

    prepared, meta = prepare_params(params)          # one-time prep (hoisted)
    fwd = jax.jit(lambda a, v: adaptive_concat_base_forward(a, v, prepared, meta))

    out = jax.block_until_ready(fwd(audio_feature, video_feature))
    ref = reference_forward(audio_feature, video_feature, params)

    assert out.shape == (B, num_classes)
    # pooling is exact f32 now; remaining error is bf16 matmul rounding only.
    assert jnp.allclose(out, ref, atol=2e-2, rtol=2e-2), (out, ref)

    print("KERNEL_OK")
</pallas_src>

<mosaic_0001>
module attributes {stable_mosaic.version = 11 : i64} {
  func.func @kernel(%arg0: i32, %arg1: i32, %arg2: memref<4x8x32xf32, #tpu.memory_space<vmem>>, %arg3: memref<4x12x48xf32, #tpu.memory_space<vmem>>, %arg4: memref<32x128xbf16, #tpu.memory_space<vmem>>, %arg5: memref<1x128xf32, #tpu.memory_space<vmem>>, %arg6: memref<128x128xbf16, #tpu.memory_space<vmem>>, %arg7: memref<48x128xbf16, #tpu.memory_space<vmem>>, %arg8: memref<1x128xf32, #tpu.memory_space<vmem>>, %arg9: memref<128x128xbf16, #tpu.memory_space<vmem>>, %arg10: memref<256x128xbf16, #tpu.memory_space<vmem>>, %arg11: memref<128x128xbf16, #tpu.memory_space<vmem>>, %arg12: memref<1x128xf32, #tpu.memory_space<vmem>>, %arg13: memref<4x128xf32, #tpu.memory_space<vmem>>, %arg14: memref<4x32xf32, #tpu.memory_space<vmem>>, %arg15: memref<4x48xf32, #tpu.memory_space<vmem>>) attributes {dimension_semantics = [#tpu.dimension_semantics<parallel>, #tpu.dimension_semantics<arbitrary>], iteration_bounds = array<i64: 1, 1>, scalar_prefetch = 0 : i64, scratch_operands = 2 : i64, tpu.core_type = #tpu.core_type<tc>, window_params = [{transform_indices = @transform_0, window_bounds = array<i64: 4, 8, 32>}, {transform_indices = @transform_1, window_bounds = array<i64: 4, 12, 48>}, {pipeline_mode = #tpu.pipeline_mode<synchronous>, transform_indices = @transform_2, window_bounds = array<i64: 32, 128>}, {pipeline_mode = #tpu.pipeline_mode<synchronous>, transform_indices = @transform_3, window_bounds = array<i64: 1, 128>}, {pipeline_mode = #tpu.pipeline_mode<synchronous>, transform_indices = @transform_4, window_bounds = array<i64: 128, 128>}, {pipeline_mode = #tpu.pipeline_mode<synchronous>, transform_indices = @transform_5, window_bounds = array<i64: 48, 128>}, {pipeline_mode = #tpu.pipeline_mode<synchronous>, transform_indices = @transform_6, window_bounds = array<i64: 1, 128>}, {pipeline_mode = #tpu.pipeline_mode<synchronous>, transform_indices = @transform_7, window_bounds = array<i64: 128, 128>}, {pipeline_mode = #tpu.pipeline_mode<synchronous>, transform_indices = @transform_8, window_bounds = array<i64: 256, 128>}, {pipeline_mode = #tpu.pipeline_mode<synchronous>, transform_indices = @transform_9, window_bounds = array<i64: 128, 128>}, {pipeline_mode = #tpu.pipeline_mode<synchronous>, transform_indices = @transform_10, window_bounds = array<i64: 1, 128>}, {transform_indices = @transform_11, window_bounds = array<i64: 4, 128>}]} {
    %c0_i32 = arith.constant 0 : i32
    %0 = arith.cmpi eq, %arg1, %c0_i32 : i32
    %1 = arith.extui %0 : i1 to i32
    %c0_i32_0 = arith.constant 0 : i32
    %2 = arith.cmpi ne, %1, %c0_i32_0 : i32
    scf.if %2 {
      %cst_17 = arith.constant 0.000000e+00 : f32
      %16 = vector.broadcast %cst_17 : f32 to vector<4x32xf32>
      %c0_18 = arith.constant 0 : index
      %c0_19 = arith.constant 0 : index
      %17 = vector.load %arg14[%c0_18, %c0_19] : memref<4x32xf32, #tpu.memory_space<vmem>>, vector<4x32xf32>
      tpu.vector_store %arg14[%c0_18, %c0_19], %16 {strides = array<i32>} : memref<4x32xf32, #tpu.memory_space<vmem>>, vector<4x32xf32>,
      %cst_20 = arith.constant 0.000000e+00 : f32
      %18 = vector.broadcast %cst_20 : f32 to vector<4x48xf32>
      %c0_21 = arith.constant 0 : index
      %c0_22 = arith.constant 0 : index
      %19 = vector.load %arg15[%c0_21, %c0_22] : memref<4x48xf32, #tpu.memory_space<vmem>>, vector<4x48xf32>
      tpu.vector_store %arg15[%c0_21, %c0_22], %18 {strides = array<i32>} : memref<4x48xf32, #tpu.memory_space<vmem>>, vector<4x48xf32>,
    } else {
    }
    %c0 = arith.constant 0 : index
    %c0_1 = arith.constant 0 : index
    %c0_2 = arith.constant 0 : index
    %3 = vector.load %arg2[%c0, %c0_1, %c0_2] : memref<4x8x32xf32, #tpu.memory_space<vmem>>, vector<4x8x32xf32>
    %c0_3 = arith.constant 0 : index
    %c0_4 = arith.constant 0 : index
    %4 = vector.load %arg14[%c0_3, %c0_4] : memref<4x32xf32, #tpu.memory_space<vmem>>, vector<4x32xf32>
    %cst = arith.constant dense<0.000000e+00> : vector<4x32xf32>
    %5 = vector.multi_reduction <add>, %3, %cst [1] : vector<4x8x32xf32> to vector<4x32xf32>
    %6 = arith.addf %4, %5 : vector<4x32xf32>
    %c0_5 = arith.constant 0 : index
    %c0_6 = arith.constant 0 : index
    %7 = vector.load %arg14[%c0_5, %c0_6] : memref<4x32xf32, #tpu.memory_space<vmem>>, vector<4x32xf32>
    tpu.vector_store %arg14[%c0_5, %c0_6], %6 {strides = array<i32>} : memref<4x32xf32, #tpu.memory_space<vmem>>, vector<4x32xf32>,
    %c0_7 = arith.constant 0 : index
    %c0_8 = arith.constant 0 : index
    %c0_9 = arith.constant 0 : index
    %8 = vector.load %arg3[%c0_7, %c0_8, %c0_9] : memref<4x12x48xf32, #tpu.memory_space<vmem>>, vector<4x12x48xf32>
    %c0_10 = arith.constant 0 : index
    %c0_11 = arith.constant 0 : index
    %9 = vector.load %arg15[%c0_10, %c0_11] : memref<4x48xf32, #tpu.memory_space<vmem>>, vector<4x48xf32>
    %cst_12 = arith.constant dense<0.000000e+00> : vector<4x48xf32>
    %10 = vector.multi_reduction <add>, %8, %cst_12 [1] : vector<4x12x48xf32> to vector<4x48xf32>
    %11 = arith.addf %9, %10 : vector<4x48xf32>
    %c0_13 = arith.constant 0 : index
    %c0_14 = arith.constant 0 : index
    %12 = vector.load %arg15[%c0_13, %c0_14] : memref<4x48xf32, #tpu.memory_space<vmem>>, vector<4x48xf32>
    tpu.vector_store %arg15[%c0_13, %c0_14], %11 {strides = array<i32>} : memref<4x48xf32, #tpu.memory_space<vmem>>, vector<4x48xf32>,
    %c0_i32_15 = arith.constant 0 : i32
    %13 = arith.cmpi eq, %arg1, %c0_i32_15 : i32
    %14 = arith.extui %13 : i1 to i32
    %c0_i32_16 = arith.constant 0 : i32
    %15 = arith.cmpi ne, %14, %c0_i32_16 : i32
    scf.if %15 {
      %c0_17 = arith.constant 0 : index
      %c0_18 = arith.constant 0 : index
      %16 = vector.load %arg14[%c0_17, %c0_18] : memref<4x32xf32, #tpu.memory_space<vmem>>, vector<4x32xf32>
      %cst_19 = arith.constant 1.250000e-01 : f32
      %17 = vector.broadcast %cst_19 : f32 to vector<4x32xf32>
      %18 = arith.mulf %16, %17 : vector<4x32xf32>
      %19 = arith.truncf %18 : vector<4x32xf32> to vector<4x32xbf16>
      %c0_20 = arith.constant 0 : index
      %c0_21 = arith.constant 0 : index
      %20 = vector.load %arg15[%c0_20, %c0_21] : memref<4x48xf32, #tpu.memory_space<vmem>>, vector<4x48xf32>
      %cst_22 = arith.constant 0.0833333358 : f32
      %21 = vector.broadcast %cst_22 : f32 to vector<4x48xf32>
      %22 = arith.mulf %20, %21 : vector<4x48xf32>
      %23 = arith.truncf %22 : vector<4x48xf32> to vector<4x48xbf16>
      %c0_23 = arith.constant 0 : index
      %c0_24 = arith.constant 0 : index
      %24 = vector.load %arg4[%c0_23, %c0_24] : memref<32x128xbf16, #tpu.memory_space<vmem>>, vector<32x128xbf16>
      %cst_25 = arith.constant dense<0.000000e+00> : vector<4x128xf32>
      %25 = tpu.matmul %19, %24, %cst_25 {dimension_numbers = #tpu.dot_dimension_numbers<[1], [0], [0], [1], [0, 0, 1, 1], [], []>} : vector<4x32xbf16>, vector<32x128xbf16>, vector<4x128xf32> -> vector<4x128xf32>
      %c0_26 = arith.constant 0 : index
      %c0_27 = arith.constant 0 : index
      %26 = vector.load %arg5[%c0_26, %c0_27] : memref<1x128xf32, #tpu.memory_space<vmem>>, vector<1x128xf32>
      %27 = vector.broadcast %26 : vector<1x128xf32> to vector<4x128xf32>
      %28 = arith.addf %25, %27 : vector<4x128xf32>
      %cst_28 = arith.constant 0.000000e+00 : f32
      %29 = vector.broadcast %cst_28 : f32 to vector<4x128xf32>
      %30 = arith.maximumf %28, %29 : vector<4x128xf32>
      %31 = arith.truncf %30 : vector<4x128xf32> to vector<4x128xbf16>
      %c0_29 = arith.constant 0 : index
      %c0_30 = arith.constant 0 : index
      %32 = vector.load %arg6[%c0_29, %c0_30] : memref<128x128xbf16, #tpu.memory_space<vmem>>, vector<128x128xbf16>
      %cst_31 = arith.constant dense<0.000000e+00> : vector<4x128xf32>
      %33 = tpu.matmul %31, %32, %cst_31 {dimension_numbers = #tpu.dot_dimension_numbers<[1], [0], [0], [1], [0, 0, 1, 1], [], []>} : vector<4x128xbf16>, vector<128x128xbf16>, vector<4x128xf32> -> vector<4x128xf32>
      %c0_32 = arith.constant 0 : index
      %c0_33 = arith.constant 0 : index
      %34 = vector.load %arg7[%c0_32, %c0_33] : memref<48x128xbf16, #tpu.memory_space<vmem>>, vector<48x128xbf16>
      %cst_34 = arith.constant dense<0.000000e+00> : vector<4x128xf32>
      %35 = tpu.matmul %23, %34, %cst_34 {dimension_numbers = #tpu.dot_dimension_numbers<[1], [0], [0], [1], [0, 0, 1, 1], [], []>} : vector<4x48xbf16>, vector<48x128xbf16>, vector<4x128xf32> -> vector<4x128xf32>
      %c0_35 = arith.constant 0 : index
      %c0_36 = arith.constant 0 : index
      %36 = vector.load %arg8[%c0_35, %c0_36] : memref<1x128xf32, #tpu.memory_space<vmem>>, vector<1x128xf32>
      %37 = vector.broadcast %36 : vector<1x128xf32> to vector<4x128xf32>
      %38 = arith.addf %35, %37 : vector<4x128xf32>
      %cst_37 = arith.constant 0.000000e+00 : f32
      %39 = vector.broadcast %cst_37 : f32 to vector<4x128xf32>
      %40 = arith.maximumf %38, %39 : vector<4x128xf32>
      %41 = arith.truncf %40 : vector<4x128xf32> to vector<4x128xbf16>
      %c0_38 = arith.constant 0 : index
      %c0_39 = arith.constant 0 : index
      %42 = vector.load %arg9[%c0_38, %c0_39] : memref<128x128xbf16, #tpu.memory_space<vmem>>, vector<128x128xbf16>
      %cst_40 = arith.constant dense<0.000000e+00> : vector<4x128xf32>
      %43 = tpu.matmul %41, %42, %cst_40 {dimension_numbers = #tpu.dot_dimension_numbers<[1], [0], [0], [1], [0, 0, 1, 1], [], []>} : vector<4x128xbf16>, vector<128x128xbf16>, vector<4x128xf32> -> vector<4x128xf32>
      %44 = tpu.concatenate %33, %43 in 1 : vector<4x128xf32>, vector<4x128xf32> -> vector<4x256xf32>
      %45 = arith.truncf %44 : vector<4x256xf32> to vector<4x256xbf16>
      %c0_41 = arith.constant 0 : index
      %c0_42 = arith.constant 0 : index
      %46 = vector.load %arg10[%c0_41, %c0_42] : memref<256x128xbf16, #tpu.memory_space<vmem>>, vector<256x128xbf16>
      %cst_43 = arith.constant dense<0.000000e+00> : vector<4x128xf32>
      %47 = tpu.matmul %45, %46, %cst_43 {dimension_numbers = #tpu.dot_dimension_numbers<[1], [0], [0], [1], [0, 0, 1, 1], [], []>} : vector<4x256xbf16>, vector<256x128xbf16>, vector<4x128xf32> -> vector<4x128xf32>
      %48 = arith.truncf %47 : vector<4x128xf32> to vector<4x128xbf16>
      %c0_44 = arith.constant 0 : index
      %c0_45 = arith.constant 0 : index
      %49 = vector.load %arg11[%c0_44, %c0_45] : memref<128x128xbf16, #tpu.memory_space<vmem>>, vector<128x128xbf16>
      %cst_46 = arith.constant dense<0.000000e+00> : vector<4x128xf32>
      %50 = tpu.matmul %48, %49, %cst_46 {dimension_numbers = #tpu.dot_dimension_numbers<[1], [0], [0], [1], [0, 0, 1, 1], [], []>} : vector<4x128xbf16>, vector<128x128xbf16>, vector<4x128xf32> -> vector<4x128xf32>
      %c0_47 = arith.constant 0 : index
      %c0_48 = arith.constant 0 : index
      %51 = vector.load %arg12[%c0_47, %c0_48] : memref<1x128xf32, #tpu.memory_space<vmem>>, vector<1x128xf32>
      %52 = vector.broadcast %51 : vector<1x128xf32> to vector<4x128xf32>
      %53 = arith.addf %50, %52 : vector<4x128xf32>
      %c0_49 = arith.constant 0 : index
      %c0_50 = arith.constant 0 : index
      %54 = vector.load %arg13[%c0_49, %c0_50] : memref<4x128xf32, #tpu.memory_space<vmem>>, vector<4x128xf32>
      tpu.vector_store %arg13[%c0_49, %c0_50], %53 {strides = array<i32>} : memref<4x128xf32, #tpu.memory_space<vmem>>, vector<4x128xf32>,
    } else {
    }
    return
  }
  func.func @transform_0(%arg0: i32, %arg1: i32) -> (i32, i32, i32) {
    %c0_i32 = arith.constant 0 : i32
    %c0_i32_0 = arith.constant 0 : i32
    return %arg0, %arg1, %c0_i32 : i32, i32, i32
  }
  func.func @transform_1(%arg0: i32, %arg1: i32) -> (i32, i32, i32) {
    %c0_i32 = arith.constant 0 : i32
    %c0_i32_0 = arith.constant 0 : i32
    return %arg0, %arg1, %c0_i32 : i32, i32, i32
  }
  func.func @transform_2(%arg0: i32, %arg1: i32) -> (i32, i32) {
    %c0_i32 = arith.constant 0 : i32
    %c0_i32_0 = arith.constant 0 : i32
    %c0_i32_1 = arith.constant 0 : i32
    return %c0_i32, %c0_i32_0 : i32, i32
  }
  func.func @transform_3(%arg0: i32, %arg1: i32) -> (i32, i32) {
    %c0_i32 = arith.constant 0 : i32
    %c0_i32_0 = arith.constant 0 : i32
    %c0_i32_1 = arith.constant 0 : i32
    return %c0_i32, %c0_i32_0 : i32, i32
  }
  func.func @transform_4(%arg0: i32, %arg1: i32) -> (i32, i32) {
    %c0_i32 = arith.constant 0 : i32
    %c0_i32_0 = arith.constant 0 : i32
    %c0_i32_1 = arith.constant 0 : i32
    return %c0_i32, %c0_i32_0 : i32, i32
  }
  func.func @transform_5(%arg0: i32, %arg1: i32) -> (i32, i32) {
    %c0_i32 = arith.constant 0 : i32
    %c0_i32_0 = arith.constant 0 : i32
    %c0_i32_1 = arith.constant 0 : i32
    return %c0_i32, %c0_i32_0 : i32, i32
  }
  func.func @transform_6(%arg0: i32, %arg1: i32) -> (i32, i32) {
    %c0_i32 = arith.constant 0 : i32
    %c0_i32_0 = arith.constant 0 : i32
    %c0_i32_1 = arith.constant 0 : i32
    return %c0_i32, %c0_i32_0 : i32, i32
  }
  func.func @transform_7(%arg0: i32, %arg1: i32) -> (i32, i32) {
    %c0_i32 = arith.constant 0 : i32
    %c0_i32_0 = arith.constant 0 : i32
    %c0_i32_1 = arith.constant 0 : i32
    return %c0_i32, %c0_i32_0 : i32, i32
  }
  func.func @transform_8(%arg0: i32, %arg1: i32) -> (i32, i32) {
    %c0_i32 = arith.constant 0 : i32
    %c0_i32_0 = arith.constant 0 : i32
    %c0_i32_1 = arith.constant 0 : i32
    return %c0_i32, %c0_i32_0 : i32, i32
  }
  func.func @transform_9(%arg0: i32, %arg1: i32) -> (i32, i32) {
    %c0_i32 = arith.constant 0 : i32
    %c0_i32_0 = arith.constant 0 : i32
    %c0_i32_1 = arith.constant 0 : i32
    return %c0_i32, %c0_i32_0 : i32, i32
  }
  func.func @transform_10(%arg0: i32, %arg1: i32) -> (i32, i32) {
    %c0_i32 = arith.constant 0 : i32
    %c0_i32_0 = arith.constant 0 : i32
    %c0_i32_1 = arith.constant 0 : i32
    return %c0_i32, %c0_i32_0 : i32, i32
  }
  func.func @transform_11(%arg0: i32, %arg1: i32) -> (i32, i32) {
    %c0_i32 = arith.constant 0 : i32
    %c0_i32_0 = arith.constant 0 : i32
    return %arg0, %c0_i32 : i32, i32
  }
}

</mosaic_0001>

<bundles_post_ra>
// kernel: _lambda_.1
= control target key start
LH: loop header
LB: loop body
LE: loop exit
PB: predicated region body
PF: predicated region fallthrough
CT: control target
= control target key end

     0   :  { %16 = vsyncpa [#allocation5], 0  ;;  %s1590_s0 = inlined_call_operand.vmem [shape: f32[4,8,32], index: 0, kind: input, shape index: {}]   ;;  %s1591_s1 = inlined_call_operand.vmem [shape: f32[4,12,48], index: 1, kind: input, shape index: {}]   ;;  %s1592_s2 = inlined_call_operand.hbm [shape: bf16[32,128], index: 2, kind: input, shape index: {}]   ;;  %s1593_s3 = inlined_call_operand.vmem [shape: f32[1,128], index: 3, kind: input, shape index: {}]   ;;  %s1594_s4 = inlined_call_operand.hbm [shape: bf16[128,128], index: 4, kind: input, shape index: {}]   ;;  %s1595_s5 = inlined_call_operand.hbm [shape: bf16[48,128], index: 5, kind: input, shape index: {}]   ;;  %s1596_s6 = inlined_call_operand.vmem [shape: f32[1,128], index: 6, kind: input, shape index: {}]   ;;  %s1597_s7 = inlined_call_operand.hbm [shape: bf16[128,128], index: 7, kind: input, shape index: {}]   ;;  %s1598_s8 = inlined_call_operand.vmem [shape: bf16[256,128], index: 8, kind: input, shape index: {}]   ;;  %s1599_s9 = inlined_call_operand.hbm [shape: bf16[128,128], index: 9, kind: input, shape index: {}]   ;;  %s1600_s10 = inlined_call_operand.vmem [shape: f32[1,128], index: 10, kind: input, shape index: {}]   ;;  %s1601_s11 = inlined_call_operand.hbm [shape: f32[4,128], index: 11, kind: output, shape index: {}]  }
   0x1   :  { %17 = vsyncpa [#allocation8], 0 }
   0x2   :  { %18 = vsyncpa [#allocation11], 0 }
   0x3   :  { %19 = vsyncpa [#allocation6], 0  ;;  %s1261_s17 = smov [#allocation7]   ;;  %s1262_s19 = smov [#allocation10]  }
   0x4   :  { %s43_s18 = sshll.u32 %s1261_s17, 4  ;;  %s69_s20 = sshll.u32 %s1262_s19, 4  ;;  %s44_s18 = int_to_ptr.vmem [resolvable:$true] %s43_s18  ;;  %s1331_s20 = int_to_ptr.vmem [resolvable:$true] %s69_s20 }
   0x5   :  { %s1121_s23 = scalar_lea.hbm %s1594_s4, 1024 }
   0x6   :  { %p1122_p0 = scmp.ne.s32.totalorder %s1594_s4, %s1121_s23  ;;  %p1125_p1 = scmp.lt.u32.totalorder %s1121_s23, %s1594_s4 }
   0x8   :  { %p1127_p2 = pnand %p1125_p1, %p1122_p0 }
   0xa   :  { %1130 = shalt.err (!%p1127_p2)
}
   0xb   :  { %s1131_s28 = scalar_lea.vmem %s44_s18, 1024  ;;  %p1136_p4 = scmp.lt.s32.totalorder %s44_s18, %s44_s18 }
   0xc   :  { %p1132_p3 = scmp.ne.s32.totalorder %s44_s18, %s1131_s28  ;;  %p1137_p5 = scmp.lt.s32.totalorder %s1131_s28, %s1131_s28 }
   0xe   :  { %p1138_p6 = por %p1137_p5, %p1136_p4 }
  0x10   :  { %p1139_p7 = pnand %p1138_p6, %p1132_p3 }
  0x12   :  { %1142 = shalt.err (!%p1139_p7)
}
  0x13   :  { %s1263_s29 = smov 64   ;;  %s1264_s30 = smov 4  }
  0x14   :  { %49 = dma.hbm_to_vmem [thread:$0]  %s1594_s4, 1024, %s44_s18, [#allocation8], %s1263_s29, %s1263_s29, %s1264_s30  }
  0x15   :  { %s1143_s16 = scalar_lea.hbm %s1597_s7, 1024 }
  0x16   :  { %p1144_p8 = scmp.ne.s32.totalorder %s1597_s7, %s1143_s16  ;;  %p1147_p9 = scmp.lt.u32.totalorder %s1143_s16, %s1597_s7 }
  0x18   :  { %p1149_p10 = pnand %p1147_p9, %p1144_p8 }
  0x1a   :  { %1152 = shalt.err (!%p1149_p10)
}
  0x1b   :  { %s1153_s23 = scalar_lea.vmem %s1331_s20, 1024  ;;  %p1158_p12 = scmp.lt.s32.totalorder %s1331_s20, %s1331_s20 }
  0x1c   :  { %p1154_p11 = scmp.ne.s32.totalorder %s1331_s20, %s1153_s23  ;;  %p1159_p13 = scmp.lt.s32.totalorder %s1153_s23, %s1153_s23 }
  0x1e   :  { %p1160_p0 = por %p1159_p13, %p1158_p12 }
  0x20   :  { %p1161_p1 = pnand %p1160_p0, %p1154_p11 }
  0x22   :  { %1164 = shalt.err (!%p1161_p1)
}
  0x23   :  { %75 = dma.hbm_to_vmem [thread:$0]  %s1597_s7, 1024, %s1331_s20, [#allocation11], %s1263_s29, %s1263_s29, %s1264_s30  }
  0x24   :  { %s1265_s24 = smov [#allocation4]   ;;  %s1266_s26 = smov [#allocation9]  }
  0x25   :  { %s29_s25 = sshll.u32 %s1265_s24, 4  ;;  %s55_s27 = sshll.u32 %s1266_s26, 4  ;;  %s30_s25 = int_to_ptr.vmem [resolvable:$true] %s29_s25  ;;  %s1368_s27 = int_to_ptr.vmem [resolvable:$true] %s55_s27 }
  0x26   :  { %s1165_s13 = scalar_lea.hbm %s1592_s2, 256 }
  0x27   :  { %p1166_p2 = scmp.ne.s32.totalorder %s1592_s2, %s1165_s13  ;;  %p1169_p3 = scmp.lt.u32.totalorder %s1165_s13, %s1592_s2 }
  0x29   :  { %p1171_p4 = pnand %p1169_p3, %p1166_p2 }
  0x2b   :  { %1174 = shalt.err (!%p1171_p4)
}
  0x2c   :  { %s1175_s7 = scalar_lea.vmem %s30_s25, 256  ;;  %p1180_p6 = scmp.lt.s32.totalorder %s30_s25, %s30_s25 }
  0x2d   :  { %p1176_p5 = scmp.ne.s32.totalorder %s30_s25, %s1175_s7  ;;  %p1181_p7 = scmp.lt.s32.totalorder %s1175_s7, %s1175_s7 }
  0x2f   :  { %p1182_p8 = por %p1181_p7, %p1180_p6 }
  0x31   :  { %p1183_p9 = pnand %p1182_p8, %p1176_p5 }
  0x33   :  { %1186 = shalt.err (!%p1183_p9)
}
  0x34   :  { %35 = dma.hbm_to_vmem [thread:$0]  %s1592_s2, 256, %s30_s25, [#allocation5], %s1263_s29, %s1263_s29, %s1264_s30  }
  0x35   :  { %s1187_s23 = scalar_lea.hbm %s1595_s5, 384 }
  0x36   :  { %p1188_p10 = scmp.ne.s32.totalorder %s1595_s5, %s1187_s23  ;;  %p1191_p11 = scmp.lt.u32.totalorder %s1187_s23, %s1595_s5 }
  0x38   :  { %p1193_p12 = pnand %p1191_p11, %p1188_p10 }
  0x3a   :  { %1196 = shalt.err (!%p1193_p12)
}
  0x3b   :  { %s1197_s28 = scalar_lea.vmem %s1368_s27, 384  ;;  %p1202_p0 = scmp.lt.s32.totalorder %s1368_s27, %s1368_s27 }
  0x3c   :  { %p1198_p13 = scmp.ne.s32.totalorder %s1368_s27, %s1197_s28  ;;  %p1203_p1 = scmp.lt.s32.totalorder %s1197_s28, %s1197_s28 }
  0x3e   :  { %p1204_p2 = por %p1203_p1, %p1202_p0 }
  0x40   :  { %p1205_p3 = pnand %p1204_p2, %p1198_p13 }
  0x42   :  { %1208 = shalt.err (!%p1205_p3)
}
  0x43   :  { %61 = dma.hbm_to_vmem [thread:$0]  %s1595_s5, 384, %s1368_s27, [#allocation8], %s1263_s29, %s1263_s29, %s1264_s30  }
  0x44   :  { %s1267_s12 = smov [#allocation12]   ;;  %s1209_s16 = scalar_lea.hbm %s1599_s9, 1024 }
  0x45   :  { %s83_s13 = sshll.u32 %s1267_s12, 4  ;;  %p1210_p4 = scmp.ne.s32.totalorder %s1599_s9, %s1209_s16  ;;  %s84_s13 = int_to_ptr.vmem [resolvable:$true] %s83_s13 }
  0x46   :  { %p1213_p5 = scmp.lt.u32.totalorder %s1209_s16, %s1599_s9 }
  0x48   :  { %p1215_p6 = pnand %p1213_p5, %p1210_p4 }
  0x4a   :  { %1218 = shalt.err (!%p1215_p6)
}
  0x4b   :  { %s1219_s21 = scalar_lea.vmem %s84_s13, 1024  ;;  %p1224_p8 = scmp.lt.s32.totalorder %s84_s13, %s84_s13 }
  0x4c   :  { %p1220_p7 = scmp.ne.s32.totalorder %s84_s13, %s1219_s21  ;;  %p1225_p9 = scmp.lt.s32.totalorder %s1219_s21, %s1219_s21 }
  0x4e   :  { %p1226_p10 = por %p1225_p9, %p1224_p8 }
  0x50   :  { %p1227_p11 = pnand %p1226_p10, %p1220_p7 }
  0x52   :  { %1230 = shalt.err (!%p1227_p11)
}
  0x53   :  { %89 = dma.hbm_to_vmem [thread:$0]  %s1599_s9, 1024, %s84_s13, [#allocation11], %s1263_s29, %s1263_s29, %s1264_s30  }
  0x54   :  { %1253 = dma.done.wait [#allocation5], 256  }
  0x55   :  { %1254 = vsyncadd [#allocation5], 4294967040 }
  0x56   :  { %1255 = dma.done.wait [#allocation8], 1408  }
  0x57   :  { %1256 = vsyncadd [#allocation8], 4294965888 }
  0x58   :  { %1257 = dma.done.wait [#allocation11], 2048  }
  0x59   :  { %1258 = vsyncadd [#allocation11], 4294965248  ;;  %vm112_vm0 = vcmask 257024   ;;  %v1268_v0 = vmov 0.0   ;;  %vm114_vm1 = vcmask 388096   ;;  %vm1269_vm2 = vmmov 0  }
  0x5a   :  { %1016 = vmatprep.subr.bf16.mxu0 %v1268_v0  ;;  %988 = vmatprep.subr.bf16.mxu1 %v1268_v0  ;;  %113 = vst.msk [vmem:[#allocation2] sm:$0xf] %vm112_vm0, %v1268_v0  ;;  %v1076_v1 = vld [vmem:[#allocation9] sm:$0xff]   ;;  %v1077_v2 = vld [vmem:[#allocation4] sm:$0xff]   ;;  %v1078_v3 = vld [vmem:[#allocation9 + $0x8] sm:$0xff]   ;;  %vm121_vm3 = vcmask 261120  }
  0x5b   :  { %992 = vmatprep.mubr.msk.bf16.mxu1 %vm1269_vm2, %v1268_v0  ;;  %1022 = vmatprep.mubr.msk.bf16.mxu0 %vm1269_vm2, %v1268_v0  ;;  %115 = vst.msk [vmem:[#allocation3] sm:$0xf] %vm114_vm1, %v1268_v0  ;;  %v1079_v4 = vld [vmem:[#allocation4 + $0x8] sm:$0xff]   ;;  %v116_v5 = vld [vmem:[%s1590_s0] sm:$0xff]  ;;  %v117_v6 = vld [vmem:[%s1590_s0 + $0x8] sm:$0xff]  ;;  %vm173_vm4 = vcmask 392192  }
  0x5c   :  { %1017 = vmatpush3.bf16.msra.mxu0 %v1076_v1  ;;  %989 = vmatpush3.bf16.msra.mxu1 %v1077_v2  ;;  %v118_v7 = vld [vmem:[%s1590_s0 + $0x10] sm:$0xff]  ;;  %v1080_v8 = vld [vmem:[#allocation9 + $0x10] sm:$0xff]   ;;  %v119_v9 = vld [vmem:[%s1590_s0 + $0x18] sm:$0xff]  ;;  %v122_v10 = vsel %vm121_vm3, %v116_v5, 0.0  ;;  %v129_v11 = vsel %vm121_vm3, %v117_v6, 0.0  ;;  %vm154_vm5 = vcmask 1041409  }
  0x5d   :  { %1018 = vmatprep.subr.bf16.mxu0 %v1268_v0  ;;  %990 = vmatprep.subr.bf16.mxu1 %v1268_v0  ;;  %v136_v12 = vsel %vm121_vm3, %v118_v7, 0.0  ;;  %v123_v13 = vrot.slane %v122_v10, 4  ;;  %v130_v14 = vrot.slane %v129_v11, 4  ;;  %v143_v16 = vsel %vm121_vm3, %v119_v9, 0.0  ;;  %v164_v17 = vld [vmem:[%s1591_s1] sm:$0xff]  ;;  %v166_v18 = vld [vmem:[%s1591_s1 + $0x10] sm:$0xff] }
  0x5e   :  { %v137_v15 = vrot.slane %v136_v12, 4  ;;  %v144_v19 = vrot.slane %v143_v16, 4  ;;  %v165_v20 = vld [vmem:[%s1591_s1 + $0x8] sm:$0xf]  ;;  %v167_v21 = vld [vmem:[%s1591_s1 + $0x18] sm:$0xf] }
  0x5f   :  { %v124_v22 = vadd.f32 %v123_v13, %v122_v10  ;;  %v131_v23 = vadd.f32 %v130_v14, %v129_v11  ;;  %vm156_vm6 = vcmask 1042434   ;;  %v168_v25 = vld [vmem:[%s1591_s1 + $0x20] sm:$0xff]  ;;  %v169_v26 = vld [vmem:[%s1591_s1 + $0x28] sm:$0xf]  ;;  %v174_v27 = vsel %vm173_vm4, %v164_v17, 0.0  ;;  %v170_v35 = vld [vmem:[%s1591_s1 + $0x30] sm:$0xff] }
  0x60   :  { %1019 = vmatpush3.bf16.msra.mxu0 %v1078_v3  ;;  %991 = vmatpush3.bf16.msra.mxu1 %v1079_v4  ;;  %v138_v24 = vadd.f32 %v137_v15, %v136_v12  ;;  %v145_v28 = vadd.f32 %v144_v19, %v143_v16  ;;  %vm158_vm7 = vcmask 1043459   ;;  %v176_v29 = vsel %vm114_vm1, %v165_v20, 0.0  ;;  %v171_v36 = vld [vmem:[%s1591_s1 + $0x38] sm:$0xf]  ;;  %s1270_s24 = smov [#allocation13]  }
  0x61   :  { %1020 = vmatprep.subr.bf16.mxu0 %v1268_v0  ;;  %996 = vmatprep.subr.bf16.mxu1 %v1268_v0  ;;  %v184_v30 = vsel %vm173_vm4, %v166_v18, 0.0  ;;  %v185_v31 = vsel %vm114_vm1, %v167_v21, 0.0  ;;  %v125_v32 = vrot.slane %v124_v22, 2  ;;  %v132_v33 = vrot.slane %v131_v23, 2  ;;  %v120_v58 = vld [vmem:[#allocation2] sm:$0xf] }
  0x62   :  { %v139_v34 = vrot.slane %v138_v24, 2  ;;  %v177_v37 = vadd.f32 %v176_v29, %v174_v27  ;;  %v146_v38 = vrot.slane %v145_v28, 2  ;;  %v186_v39 = vadd.f32 %v185_v31, %v184_v30  ;;  %v1081_v30 = vld [vmem:[#allocation7] sm:$0xff]  }
  0x63   :  { %v193_v40 = vsel %vm173_vm4, %v168_v25, 0.0  ;;  %v194_v41 = vsel %vm114_vm1, %v169_v26, 0.0  ;;  %v126_v42 = vadd.f32 %v125_v32, %v124_v22  ;;  %v133_v43 = vadd.f32 %v132_v33, %v131_v23  ;;  %v172_v23 = vld [vmem:[#allocation3] sm:$0xf] }
  0x64   :  { %1021 = vmatpush3.bf16.msra.mxu0 %v1080_v8  ;;  %v140_v44 = vadd.f32 %v139_v34, %v138_v24  ;;  %v178_v45 = vrot.slane %v177_v37, 4  ;;  %v147_v46 = vadd.f32 %v146_v38, %v145_v28  ;;  %v187_v47 = vrot.slane %v186_v39, 4  ;;  %v1083_v33 = vld [vmem:[#allocation7 + $0x8] sm:$0xff]   ;;  %v1085_v34 = vld [vmem:[#allocation7 + $0x10] sm:$0xff]  }
  0x65   :  { %1026 = vmatprep.subr.bf16.mxu0 %v1268_v0  ;;  %v195_v48 = vadd.f32 %v194_v41, %v193_v40  ;;  %v202_v49 = vsel %vm173_vm4, %v170_v35, 0.0  ;;  %v127_v50 = vrot.slane %v126_v42, 1  ;;  %v134_v51 = vrot.slane %v133_v43, 1  ;;  %v1084_v40 = vld [vmem:[#allocation10 + $0x8] sm:$0xff]  }
  0x66   :  { %v141_v52 = vrot.slane %v140_v44, 1  ;;  %v179_v53 = vadd.f32 %v178_v45, %v177_v37  ;;  %v148_v54 = vrot.slane %v147_v46, 1  ;;  %v188_v55 = vadd.f32 %v187_v47, %v186_v39  ;;  %v1087_v39 = vld [vmem:[#allocation7 + $0x18] sm:$0xff]   ;;  %v1089_v41 = vld [vmem:[#allocation7 + $0x20] sm:$0xff]   ;;  %v1093_v47 = vld [vmem:[#allocation7 + $0x30] sm:$0xff]  }
  0x67   :  { %v196_v56 = vrot.slane %v195_v48, 4  ;;  %v203_v57 = vsel %vm114_vm1, %v171_v36, 0.0  ;;  %v128_v59 = vadd.f32 %v127_v50, %v126_v42  ;;  %v135_v60 = vadd.f32 %v134_v51, %v133_v43  ;;  %v1082_v36 = vld [vmem:[#allocation10] sm:$0xff]   ;;  %v1086_v42 = vld [vmem:[#allocation10 + $0x10] sm:$0xff]   ;;  %v1096_v50 = vld [vmem:[#allocation10 + $0x38] sm:$0xff]  }
  0x68   :  { %v142_v61 = vadd.f32 %v141_v52, %v140_v44  ;;  %v180_v62 = vrot.slane %v179_v53, 2  ;;  %v149_v63 = vadd.f32 %v148_v54, %v147_v46  ;;  %v189_v1 = vrot.slane %v188_v55, 2  ;;  %v1091_v43 = vld [vmem:[#allocation7 + $0x28] sm:$0xff]   ;;  %v1088_v44 = vld [vmem:[#allocation10 + $0x18] sm:$0xff]   ;;  %v1090_v45 = vld [vmem:[#allocation10 + $0x20] sm:$0xff]  }
  0x69   :  { %v197_v2 = vadd.f32 %v196_v56, %v195_v48  ;;  %v204_v3 = vadd.f32 %v203_v57, %v202_v49  ;;  %v155_v4 = vsel %vm154_vm5, %v135_v60, %v128_v59  ;;  %v1092_v46 = vld [vmem:[#allocation10 + $0x28] sm:$0xff]   ;;  %v1094_v48 = vld [vmem:[#allocation10 + $0x30] sm:$0xff]   ;;  %v1095_v49 = vld [vmem:[#allocation7 + $0x38] sm:$0xff]  }
  0x6a   :  { %v181_v5 = vadd.f32 %v180_v62, %v179_v53  ;;  %v157_v6 = vsel %vm156_vm6, %v142_v61, %v155_v4  ;;  %v190_v7 = vadd.f32 %v189_v1, %v188_v55  ;;  %v1097_v51 = vld [vmem:[%s1598_s8 + $0x40] sm:$0xff]   ;;  %v1099_v61 = vld [vmem:[%s1598_s8 + $0x48] sm:$0xff]   ;;  %v1101_v1 = vld [vmem:[%s1598_s8 + $0x50] sm:$0xff]  }
  0x6b   :  { %v198_v8 = vrot.slane %v197_v2, 2  ;;  %v205_v9 = vrot.slane %v204_v3, 4  ;;  %v159_v10 = vsel %vm158_vm7, %v149_v63, %v157_v6  ;;  %v882_v52 = vld [vmem:[%s1593_s3] ss:$0 sm:$0xff]  ;;  %v1100_v62 = vld [vmem:[%s1598_s8 + $0x8] sm:$0xff]   ;;  %s871_s3 = sshll.u32 %s1270_s24, 4  ;;  %s872_s3 = int_to_ptr.vmem [resolvable:$true] %s871_s3 }
  0x6c   :  { %v182_v11 = vrot.slane %v181_v5, 1  ;;  %v161_v12 = vadd.f32 %v159_v10, %v120_v58  ;;  %v191_v13 = vrot.slane %v190_v7, 1  ;;  %v1098_v59 = vld [vmem:[%s1598_s8] sm:$0xff]   ;;  %s1231_s26 = scalar_lea.vmem %s872_s3, 64  ;;  %p1236_p13 = scmp.lt.s32.totalorder %s872_s3, %s872_s3 }
  0x6d   :  { %v199_v14 = vadd.f32 %v198_v8, %v197_v2  ;;  %v206_v15 = vadd.f32 %v205_v9, %v204_v3  ;;  %v894_v63 = vld [vmem:[%s1596_s6] ss:$0 sm:$0xff]  ;;  %p1232_p12 = scmp.ne.s32.totalorder %s872_s3, %s1231_s26  ;;  %p1237_p0 = scmp.lt.s32.totalorder %s1231_s26, %s1231_s26 }
  0x6e   :  { %v183_v16 = vadd.f32 %v182_v11, %v181_v5  ;;  %163 = vst.msk [vmem:[#allocation2] sm:$0xf] %vm112_vm0, %v161_v12  ;;  %v192_v17 = vadd.f32 %v191_v13, %v190_v7  ;;  %v1102_v5 = vld [vmem:[%s1598_s8 + $0x10] sm:$0xff]   ;;  %v1103_v7 = vld [vmem:[%s1598_s8 + $0x58] sm:$0xff]   ;;  %v1105_v12 = vld [vmem:[%s1598_s8 + $0x60] sm:$0xff]  }
  0x6f   :  { %v200_v18 = vrot.slane %v199_v14, 1  ;;  %v207_v19 = vrot.slane %v206_v15, 2  ;;  %v1104_v11 = vld [vmem:[%s1598_s8 + $0x18] sm:$0xff]   ;;  %v1106_v13 = vld [vmem:[%s1598_s8 + $0x20] sm:$0xff]   ;;  %p1238_p1 = por %p1237_p0, %p1236_p13 }
  0x70   :  { %v215_v22 = vsel %vm154_vm5, %v192_v17, %v183_v16  ;;  %v1109_v16 = vld [vmem:[%s1598_s8 + $0x70] sm:$0xff]  }
  0x71   :  { %v201_v20 = vadd.f32 %v200_v18, %v199_v14  ;;  %v208_v21 = vadd.f32 %v207_v19, %v206_v15  ;;  %v1107_v14 = vld [vmem:[%s1598_s8 + $0x68] sm:$0xff]   ;;  %v1110_v17 = vld [vmem:[%s1598_s8 + $0x30] sm:$0xff]   ;;  %v1111_v18 = vld [vmem:[%s1598_s8 + $0x78] sm:$0xff]   ;;  %p1239_p2 = pnand %p1238_p1, %p1232_p12 }
  0x72   :  { %v1108_v15 = vld [vmem:[%s1598_s8 + $0x28] sm:$0xff]   ;;  %v1112_v19 = vld [vmem:[%s1598_s8 + $0x38] sm:$0xff]  }
  0x73   :  { %v209_v24 = vrot.slane %v208_v21, 1  ;;  %v216_v25 = vsel %vm156_vm6, %v201_v20, %v215_v22  ;;  %v1113_v20 = vld [vmem:[#allocation12] sm:$0xff]   ;;  %v1115_v22 = vld [vmem:[#allocation12 + $0x10] sm:$0xff]  }
  0x75   :  { %v210_v26 = vadd.f32 %v209_v24, %v208_v21  ;;  %v224_v27 = vld [vmem:[#allocation2] sm:$0xf]  ;;  %v1114_v21 = vld [vmem:[#allocation12 + $0x8] sm:$0xff]   ;;  %v1117_v24 = vld [vmem:[#allocation12 + $0x20] sm:$0xff]  }
  0x76   :  { %v225_v28 = vmul.f32 0.125, %v224_v27 }
  0x77   :  { %v217_v29 = vsel %vm158_vm7, %v210_v26, %v216_v25  ;;  %v1118_v25 = vld [vmem:[#allocation12 + $0x28] sm:$0xff]   ;;  %v1119_v26 = vld [vmem:[#allocation12 + $0x30] sm:$0xff]  }
  0x78   :  { %v219_v31 = vadd.f32 %v217_v29, %v172_v23  ;;  %v226_v32 = vpack.c.bf16 %v225_v28, %v225_v28  ;;  %v1116_v23 = vld [vmem:[#allocation12 + $0x18] sm:$0xff]  }
  0x7a   :  { %220 = vst.msk [vmem:[#allocation3] sm:$0xf] %vm114_vm1, %v219_v31  ;;  %993 = vmatmul.mubr.msk.bf16.vlgmr.msra.gmra.mrb[0].mxu1 %vm121_vm3, %v226_v32 }
  0x7b   :  { %997 = vmatpush3.bf16.msra.mxu1 %v1081_v30  ;;  %1012 = vmatprep.mubr.msk.bf16.mxu1 %vm1269_vm2, %v1268_v0 }
  0x7c   :  { %998 = vmatprep.subr.bf16.mxu1 %v1268_v0 }
  0x7f   :  { %999 = vmatpush3.bf16.msra.mxu1 %v1083_v33 }
  0x80   :  { %1000 = vmatprep.subr.bf16.mxu1 %v1268_v0 }
  0x81   :  { %v227_v35 = vld [vmem:[#allocation3] sm:$0xf] }
  0x82   :  { %v228_v37 = vmul.f32 0.083333336, %v227_v35 }
  0x83   :  { %1001 = vmatpush3.bf16.msra.mxu1 %v1085_v34 }
  0x84   :  { %v229_v38 = vpack.c.bf16 %v228_v37, %v228_v37  ;;  %1002 = vmatprep.subr.bf16.mxu1 %v1268_v0  ;;  %v1120_v37 = vld [vmem:[#allocation12 + $0x38] sm:$0xff]  }
  0x86   :  { %1023 = vmatmul.mubr.msk.bf16.vlgmr.msra.gmra.mrb[0].mxu0 %vm173_vm4, %v229_v38 }
  0x87   :  { %1027 = vmatpush3.bf16.msra.mxu0 %v1082_v36  ;;  %1042 = vmatprep.mubr.msk.bf16.mxu0 %vm1269_vm2, %v1268_v0 }
  0x88   :  { %1028 = vmatprep.subr.bf16.mxu0 %v1268_v0  ;;  %1003 = vmatpush3.bf16.msra.mxu1 %v1087_v39 }
  0x89   :  { %1004 = vmatprep.subr.bf16.mxu1 %v1268_v0 }
  0x8b   :  { %1029 = vmatpush3.bf16.msra.mxu0 %v1084_v40 }
  0x8c   :  { %1030 = vmatprep.subr.bf16.mxu0 %v1268_v0  ;;  %1005 = vmatpush3.bf16.msra.mxu1 %v1089_v41 }
  0x8d   :  { %1006 = vmatprep.subr.bf16.mxu1 %v1268_v0 }
  0x8f   :  { %1031 = vmatpush3.bf16.msra.mxu0 %v1086_v42 }
  0x90   :  { %1032 = vmatprep.subr.bf16.mxu0 %v1268_v0  ;;  %1007 = vmatpush3.bf16.msra.mxu1 %v1091_v43  ;;  %v923_v43 = vld [vmem:[%s1600_s10] ss:$0 sm:$0xff] }
  0x91   :  { %1008 = vmatprep.subr.bf16.mxu1 %v1268_v0 }
  0x93   :  { %1033 = vmatpush3.bf16.msra.mxu0 %v1088_v44 }
  0x94   :  { %1034 = vmatprep.subr.bf16.mxu0 %v1268_v0  ;;  %1009 = vmatpush3.bf16.msra.mxu1 %v1093_v47 }
  0x95   :  { %1010 = vmatprep.subr.bf16.mxu1 %v1268_v0 }
  0x97   :  { %1035 = vmatpush3.bf16.msra.mxu0 %v1090_v45 }
  0x98   :  { %1036 = vmatprep.subr.bf16.mxu0 %v1268_v0  ;;  %1011 = vmatpush3.bf16.msra.mxu1 %v1095_v49 }
  0x99   :  { %957 = vmatprep.subr.bf16.mxu1 %v1097_v51 }
  0x9b   :  { %1037 = vmatpush3.bf16.msra.mxu0 %v1092_v46 }
  0x9c   :  { %1038 = vmatprep.subr.bf16.mxu0 %v1268_v0 }
  0x9f   :  { %1039 = vmatpush3.bf16.msra.mxu0 %v1094_v48 }
  0xa0   :  { %1040 = vmatprep.subr.bf16.mxu0 %v1268_v0 }
  0xa3   :  { %1041 = vmatpush3.bf16.msra.mxu0 %v1096_v50 }
  0xa4   :  { %1046 = vmatprep.subr.bf16.mxu0 %v1268_v0 }
 0x14d   :  { %v290_v53 = vpop.f32.mrb[0].mxu1 }
 0x14e   :  { %v291_v54 = vadd.f32 %v882_v52, %v290_v53  ;;  %v994_v55 = vpop.f32.mrb[1].mxu1 }
 0x14f   :  { %v293_v56 = vpop.f32.mrb[2].mxu1 }
 0x150   :  { %v296_v57 = vmax.f32 %v291_v54, 0.0  ;;  %v995_v58 = vpop.f32.mrb[3].mxu1 }
 0x152   :  { %v297_v60 = vpack.c.bf16 %v296_v57, %v296_v57 }
 0x154   :  { %1013 = vmatmul.mubr.bf16.vlgmr.msra.gmra.mrb[4].mxu1 %v297_v60 }
 0x155   :  { %958 = vmatpush3.bf16.msra.mxu1 %v1098_v59 }
 0x156   :  { %959 = vmatprep.subr.bf16.mxu1 %v1099_v61 }
 0x159   :  { %v470_v2 = vpop.f32.mrb[0].mxu0  ;;  %960 = vmatpush3.bf16.msra.mxu1 %v1100_v62 }
 0x15a   :  { %v471_v3 = vadd.f32 %v894_v63, %v470_v2  ;;  %v1024_v4 = vpop.f32.mrb[1].mxu0  ;;  %961 = vmatprep.subr.bf16.mxu1 %v1101_v1 }
 0x15b   :  { %v473_v6 = vpop.f32.mrb[2].mxu0 }
 0x15c   :  { %v476_v8 = vmax.f32 %v471_v3, 0.0  ;;  %v1025_v9 = vpop.f32.mrb[3].mxu0 }
 0x15d   :  { %962 = vmatpush3.bf16.msra.mxu1 %v1102_v5 }
 0x15e   :  { %v477_v10 = vpack.c.bf16 %v476_v8, %v476_v8  ;;  %963 = vmatprep.subr.bf16.mxu1 %v1103_v7 }
 0x160   :  { %1043 = vmatmul.mubr.bf16.vlgmr.msra.gmra.mrb[4].mxu0 %v477_v10 }
 0x161   :  { %1062 = vmatprep.mubr.msk.bf16.mxu0 %vm1269_vm2, %v1268_v0  ;;  %964 = vmatpush3.bf16.msra.mxu1 %v1104_v11 }
 0x162   :  { %965 = vmatprep.subr.bf16.mxu1 %v1105_v12  ;;  %1047 = vmatpush3.bf16.msra.mxu0 %v1113_v20 }
 0x163   :  { %1048 = vmatprep.subr.bf16.mxu0 %v1268_v0 }
 0x165   :  { %966 = vmatpush3.bf16.msra.mxu1 %v1106_v13 }
 0x166   :  { %967 = vmatprep.subr.bf16.mxu1 %v1107_v14  ;;  %1049 = vmatpush3.bf16.msra.mxu0 %v1114_v21 }
 0x167   :  { %1050 = vmatprep.subr.bf16.mxu0 %v1268_v0 }
 0x169   :  { %968 = vmatpush3.bf16.msra.mxu1 %v1108_v15 }
 0x16a   :  { %969 = vmatprep.subr.bf16.mxu1 %v1109_v16  ;;  %1051 = vmatpush3.bf16.msra.mxu0 %v1115_v22 }
 0x16b   :  { %1052 = vmatprep.subr.bf16.mxu0 %v1268_v0 }
 0x16d   :  { %970 = vmatpush3.bf16.msra.mxu1 %v1110_v17 }
 0x16e   :  { %971 = vmatprep.subr.bf16.mxu1 %v1111_v18  ;;  %1053 = vmatpush3.bf16.msra.mxu0 %v1116_v23 }
 0x16f   :  { %1054 = vmatprep.subr.bf16.mxu0 %v1268_v0 }
 0x171   :  { %972 = vmatpush3.bf16.msra.mxu1 %v1112_v19 }
 0x172   :  { %1055 = vmatpush3.bf16.msra.mxu0 %v1117_v24 }
 0x173   :  { %1056 = vmatprep.subr.bf16.mxu0 %v1268_v0 }
 0x176   :  { %1057 = vmatpush3.bf16.msra.mxu0 %v1118_v25 }
 0x177   :  { %1058 = vmatprep.subr.bf16.mxu0 %v1268_v0 }
 0x17a   :  { %1059 = vmatpush3.bf16.msra.mxu0 %v1119_v26 }
 0x17b   :  { %1060 = vmatprep.subr.bf16.mxu0 %v1268_v0 }
 0x17e   :  { %1061 = vmatpush3.bf16.msra.mxu0 %v1120_v37 }
 0x227   :  { %v396_v27 = vpop.f32.mrb[4].mxu1 }
 0x228   :  { %v1014_v28 = vpop.f32.mrb[5].mxu1  ;;  %v582_v31 = vpack.c.bf16 %v396_v27, %v396_v27 }
 0x229   :  { %v399_v29 = vpop.f32.mrb[6].mxu1 }
 0x22a   :  { %v1015_v30 = vpop.f32.mrb[7].mxu1 }
 0x233   :  { %v576_v32 = vpop.f32.mrb[4].mxu0 }
 0x234   :  { %v583_v33 = vpack.c.bf16 %v576_v32, %v576_v32  ;;  %v1044_v34 = vpop.f32.mrb[5].mxu0 }
 0x235   :  { %v579_v35 = vpop.f32.mrb[6].mxu0 }
 0x236   :  { %v1045_v36 = vpop.f32.mrb[7].mxu0  ;;  %744 = vmatprep.mubr.bf16.mxu1 %v583_v33 }
 0x237   :  { %745 = vmatmul.mubr.bf16.vlgmr.msra.gmra.mrb[8].mxu1 %v582_v31 }
 0x30a   :  { %v973_v38 = vpop.f32.mrb[8].mxu1 }
 0x30b   :  { %v974_v39 = vpop.f32.mrb[9].mxu1 }
 0x30c   :  { %v975_v40 = vadd.f32 %v974_v39, %v973_v38  ;;  %v976_v41 = vpop.f32.mrb[10].mxu1 }
 0x30d   :  { %v977_v42 = vpop.f32.mrb[11].mxu1 }
 0x30e   :  { %v752_v0 = vpack.c.bf16 %v975_v40, %v975_v40 }
 0x310   :  { %1063 = vmatmul.mubr.bf16.vlgmr.msra.gmra.mrb[8].mxu0 %v752_v0 }
 0x3e3   :  { %v858_v44 = vpop.f32.mrb[8].mxu0 }
 0x3e4   :  { %v859_v45 = vadd.f32 %v923_v43, %v858_v44  ;;  %v1064_v46 = vpop.f32.mrb[9].mxu0 }
 0x3e5   :  { %v861_v47 = vpop.f32.mrb[10].mxu0 }
 0x3e6   :  { %864 = vst [vmem:[#allocation13] sm:$0xf] %v859_v45  ;;  %v1065_v48 = vpop.f32.mrb[11].mxu0 }
 0x3e7   :  { %1242 = shalt.err (!%p1239_p2)
}
 0x3e8   :  { %s1243_s10 = scalar_lea.hbm %s1601_s11, 64 }
 0x3e9   :  { %p1244_p3 = scmp.ne.s32.totalorder %s1601_s11, %s1243_s10  ;;  %p1247_p4 = scmp.lt.u32.totalorder %s1243_s10, %s1601_s11 }
 0x3eb   :  { %p1249_p5 = pnand %p1247_p4, %p1244_p3 }
 0x3ed   :  { %1252 = shalt.err (!%p1249_p5)
}
 0x3ee   :  { %874 = dma.vmem_to_hbm [thread:$0]  %s872_s3, 64, %s1601_s11, [#allocation6]  }
 0x3ef   :  { %1259 = dma.done.wait [#allocation6], 64  }
 0x3f0   :  { %1260 = vsyncadd [#allocation6], 4294967232 }
 0x3f1   :  { %878 = vsyncpa [#allocation5], 1 }
 0x3f2   :  { %879 = vsyncpa [#allocation8], 1 }
 0x3f3   :  { %880 = vsyncpa [#allocation11], 1 }
 0x3f4   :  { %881 = vsyncpa [#allocation6], 1 }

</bundles_post_ra>
